<compile_context>
chip_gen: v5e
topology: v5e:2x2
jax: 0.10.0
libtpu: 0.0.40
codegen_flags: <defaults>
</compile_context>

<pallas_src>
import math
import jax
import jax.numpy as jnp
from jax.experimental import pallas as pl
from jax.experimental.pallas import tpu as pltpu


def _round_up(x, m):
    return ((x + m - 1) // m) * m


# ----------------------------- Fused Pallas kernel ------------------------------

def _make_fused_mlp_kernel(num_rest_layers):
    """Builds the kernel for L = 1 + num_rest_layers hidden layers.

    Ref layout (all weights BN-folded, zero-padded to lane multiples):
      x_ref:     (TILE_B, F_in)      streamed activation tile
      w0_ref:    (F_in, F_h)         first-layer weight (x @ W layout), VMEM-resident
      b0_ref:    (1, F_h)            first-layer bias
      [wr_ref:   (L-1, F_h, F_h)]    remaining hidden-layer weights (only if L > 1)
      [br_ref:   (L-1, 1, F_h)]      remaining hidden-layer biases
      wout_ref:  (1, F_h)            output-layer weight row
      bout_ref:  (1, 1)   SMEM       output-layer bias (scalar)
      o_ref:     (TILE_B, 1)         per-row logit (no lane broadcast)
    """

    def kernel(x_ref, w0_ref, b0_ref, *refs):
        if num_rest_layers > 0:
            wr_ref, br_ref, wout_ref, bout_ref, o_ref = refs
        else:
            wout_ref, bout_ref, o_ref = refs

        w_dtype = w0_ref.dtype
        x = x_ref[...]                                              # (TILE_B, F_in) f32
        # Layer 0: Linear + folded BN + LeakyReLU.
        y = jnp.dot(x.astype(w_dtype), w0_ref[...],
                    preferred_element_type=jnp.float32)
        y = y + b0_ref[...].astype(jnp.float32)
        x = jnp.maximum(y, 0.01 * y)                                # exact LeakyReLU(0.01)
        # Remaining layers: static unroll (short fixed trip count -> LLO visibility).
        for l in range(num_rest_layers):
            y = jnp.dot(x.astype(w_dtype), wr_ref[l],
                        preferred_element_type=jnp.float32)
            y = y + br_ref[l].astype(jnp.float32)
            x = jnp.maximum(y, 0.01 * y)
        # Final Linear(H -> 1): VPU multiply + lane reduction (no N=1 MXU column),
        # scalar bias from SMEM.
        logit = jnp.sum(x * wout_ref[...].astype(jnp.float32), axis=-1, keepdims=True)
        o_ref[...] = (logit + bout_ref[0, 0]).astype(o_ref.dtype)
        # TODO(synk): training-mode Dropout / BatchNorm batch statistics are not implemented
        # (eval-mode forward only; BN running stats are folded into the Linear weights).

    return kernel


# ----------------------------- Wrapper -------------------------------------------

def dynamic_binary_classifier_forward(x, fused):
    """x: (B, input_size) f32 -> logits (B, 1) f32 (eval-mode forward)."""
    B, in_size = x.shape
    w0, b0 = fused["w0"], fused["b0"]            # (F_in, F_h), (1, F_h)
    w_rest, b_rest = fused["w_rest"], fused["b_rest"]
    w_out, b_out = fused["w_out"], fused["b_out"]  # (1, F_h), (1, 1)
    F_in, F_h = w0.shape
    num_rest = 0 if w_rest is None else w_rest.shape[0]

    # Batch tiling: lane-aligned tiles; >=2 grid programs for megacore / v7x's 2 TCs when
    # the batch allows it; tiles up to 1024 rows to amortize ~0.35us per-grid-step overhead.
    if B <= 256:
        tile_b = _round_up(B, 8)
    else:
        tile_b = min(1024, _round_up((B + 1) // 2, 128))
    b_pad = _round_up(B, tile_b)

    # Pad once with jnp.pad; skip the copy entirely when already aligned.
    pad_b, pad_f = b_pad - B, F_in - in_size
    xp = jnp.pad(x, ((0, pad_b), (0, pad_f))) if (pad_b or pad_f) else x

    # Grid-invariant operands: constant index_map + single buffering (never re-fetched).
    resident = pl.Buffered(1)
    in_specs = [
        pl.BlockSpec((tile_b, F_in), lambda i: (i, 0)),                        # streamed
        pl.BlockSpec((F_in, F_h), lambda i: (0, 0), pipeline_mode=resident),   # resident
        pl.BlockSpec((1, F_h), lambda i: (0, 0), pipeline_mode=resident),
    ]
    operands = [xp, w0, b0]
    if num_rest > 0:
        in_specs += [
            pl.BlockSpec((num_rest, F_h, F_h), lambda i: (0, 0, 0), pipeline_mode=resident),
            pl.BlockSpec((num_rest, 1, F_h), lambda i: (0, 0, 0), pipeline_mode=resident),
        ]
        operands += [w_rest, b_rest]
    in_specs += [
        pl.BlockSpec((1, F_h), lambda i: (0, 0), pipeline_mode=resident),
        pl.BlockSpec(memory_space=pltpu.MemorySpace.SMEM),                     # scalar bias
    ]
    operands += [w_out, b_out]

    # Explicit VMEM budget: resident weights (single-buffered) + double-buffered activation
    # tiles + double-buffered (lane-padded) output blocks + headroom. Capped for v7x (64 MiB/TC).
    wbytes = w0.size * w0.dtype.itemsize + b0.size * b0.dtype.itemsize \
        + w_out.size * w_out.dtype.itemsize
    if num_rest > 0:
        wbytes += w_rest.size * w_rest.dtype.itemsize + b_rest.size * b_rest.dtype.itemsize
    need = wbytes + 2 * tile_b * F_in * xp.dtype.itemsize + 2 * tile_b * 128 * 4
    vmem_limit = int(min(64 << 20, max(need + (8 << 20), 16 << 20)))
    # TODO(synk): if the resident weight stack ever exceeds ~24 MiB (v7x budget), store the
    # weights in bf16 (weights_dtype=jnp.bfloat16) and/or stream layers via an extra
    # "arbitrary" grid axis instead of pinning the whole (L, F, F) stack.

    out = pl.pallas_call(
        _make_fused_mlp_kernel(num_rest),
        out_shape=jax.ShapeDtypeStruct((b_pad, 1), jnp.float32),
        grid=(b_pad // tile_b,),
        in_specs=in_specs,
        # (TILE_B, 1) logit column: ~128x less HBM writeback than a lane-broadcast block.
        out_specs=pl.BlockSpec((tile_b, 1), lambda i: (i, 0)),
        compiler_params=pltpu.CompilerParams(
            dimension_semantics=("parallel",),
            vmem_limit_bytes=vmem_limit,
        ),
    )(*operands)

    return out[:B]


# ----------------------------- Parameter setup -----------------------------------

def kaiming_uniform_leaky_relu(key, out_features, in_features, a=0.0):
    # torch.nn.init.kaiming_uniform_(w, nonlinearity='leaky_relu') defaults
    # (fan_in mode, a=0 -> gain = sqrt(2)).
    gain = math.sqrt(2.0 / (1.0 + a * a))
    bound = gain * math.sqrt(3.0 / in_features)
    return jax.random.uniform(
        key, (out_features, in_features), dtype=jnp.float32, minval=-bound, maxval=bound
    )


def init_params(key, input_size, hidden_size, num_layers, weights_dtype=jnp.float32):
    """Builds (a) unpadded per-layer params for the JAX reference and
    (b) BN-folded, lane-padded params for the fused kernel (first layer separated so the
    streamed input only pays for its own width)."""
    eps = 1e-5
    layers = []  # (w_folded (in, H), b_folded (H,)) -- unpadded f32
    for i in range(num_layers):
        in_size = input_size if i == 0 else hidden_size
        key, k_w, k_g, k_b, k_m, k_v = jax.random.split(key, 6)
        w = kaiming_uniform_leaky_relu(k_w, hidden_size, in_size)          # (H, in)
        b = jnp.zeros((hidden_size,), jnp.float32)                         # init.zeros_(bias)
        # BatchNorm1d params / running stats (non-trivial to exercise the fold).
        gamma = 1.0 + 0.1 * jax.random.normal(k_g, (hidden_size,), jnp.float32)
        beta = 0.1 * jax.random.normal(k_b, (hidden_size,), jnp.float32)
        run_mean = 0.1 * jax.random.normal(k_m, (hidden_size,), jnp.float32)
        run_var = 1.0 + 0.05 * jax.random.uniform(k_v, (hidden_size,), jnp.float32)
        scale = gamma / jnp.sqrt(run_var + eps)
        shift = beta - run_mean * scale
        # Fold BN: (x @ W.T + b) * scale + shift == x @ (W.T*scale) + (b*scale + shift)
        layers.append((w.T * scale[None, :], b * scale + shift))

    key, k_out = jax.random.split(key)
    w_out = kaiming_uniform_leaky_relu(k_out, 1, hidden_size)              # (1, H)
    b_out = jnp.zeros((1, 1), jnp.float32)

    # Decoupled lane padding: input width and hidden width rounded independently.
    F_in = _round_up(input_size, 128)
    F_h = _round_up(hidden_size, 128)
    # (On v6e/v7x with hidden >= 128, rounding F_h to 256 / bf16 weights better fills the
    #  256-wide MXU; v5e's 128x128 MXU is already matched.)

    w0f, b0f = layers[0]
    w0 = jnp.zeros((F_in, F_h), weights_dtype).at[:input_size, :hidden_size].set(
        w0f.astype(weights_dtype))
    b0 = jnp.zeros((1, F_h), weights_dtype).at[0, :hidden_size].set(b0f.astype(weights_dtype))

    if num_layers > 1:
        w_rest = jnp.zeros((num_layers - 1, F_h, F_h), weights_dtype)
        b_rest = jnp.zeros((num_layers - 1, 1, F_h), weights_dtype)
        for i, (wf, bf) in enumerate(layers[1:]):
            w_rest = w_rest.at[i, :hidden_size, :hidden_size].set(wf.astype(weights_dtype))
            b_rest = b_rest.at[i, 0, :hidden_size].set(bf.astype(weights_dtype))
    else:
        w_rest, b_rest = None, None

    w_out_p = jnp.zeros((1, F_h), weights_dtype).at[0, :hidden_size].set(
        w_out[0].astype(weights_dtype))

    fused = dict(w0=w0, b0=b0, w_rest=w_rest, b_rest=b_rest, w_out=w_out_p, b_out=b_out)
    ref = dict(layers=layers, w_out=w_out, b_out=b_out)
    return fused, ref


# ----------------------------- Plain-JAX reference -------------------------------

def reference_forward(x, ref):
    for wf, bf in ref["layers"]:
        y = x @ wf + bf[None, :]
        x = jnp.where(y >= 0.0, y, 0.01 * y)
    return x @ ref["w_out"].T + ref["b_out"]


# ----------------------------- Main ----------------------------------------------

if __name__ == "__main__":
    key = jax.random.PRNGKey(0)

    batch = 8
    input_size = 32
    hidden_size = 32
    num_layers = 3

    key, k_params, k_x = jax.random.split(key, 3)
    fused, ref_params = init_params(k_params, input_size, hidden_size, num_layers)
    x = jax.random.normal(k_x, (batch, input_size), dtype=jnp.float32)

    out = dynamic_binary_classifier_forward(x, fused)
    out = jax.block_until_ready(out)

    ref = reference_forward(x, ref_params)
    assert out.shape == (batch, 1), out.shape
    assert jnp.allclose(out, ref, atol=1e-4, rtol=1e-4), (out, ref)

    print("KERNEL_OK")
</pallas_src>

<mosaic_0001>
module attributes {stable_mosaic.version = 11 : i64} {
  func.func @kernel(%arg0: i32, %arg1: memref<8x128xf32, #tpu.memory_space<vmem>>, %arg2: memref<128x128xf32, #tpu.memory_space<vmem>>, %arg3: memref<1x128xf32, #tpu.memory_space<vmem>>, %arg4: memref<2x128x128xf32, #tpu.memory_space<vmem>>, %arg5: memref<2x1x128xf32, #tpu.memory_space<vmem>>, %arg6: memref<1x128xf32, #tpu.memory_space<vmem>>, %arg7: memref<1x1xf32, #tpu.memory_space<smem>>, %arg8: memref<8x1xf32, #tpu.memory_space<vmem>>) attributes {dimension_semantics = [#tpu.dimension_semantics<parallel>], iteration_bounds = array<i64: 1>, scalar_prefetch = 0 : i64, scratch_operands = 0 : i64, tpu.core_type = #tpu.core_type<tc>, window_params = [{transform_indices = @transform_0, window_bounds = array<i64: 8, 128>}, {pipeline_mode = #tpu.pipeline_mode<synchronous>, transform_indices = @transform_1, window_bounds = array<i64: 128, 128>}, {pipeline_mode = #tpu.pipeline_mode<synchronous>, transform_indices = @transform_2, window_bounds = array<i64: 1, 128>}, {pipeline_mode = #tpu.pipeline_mode<synchronous>, transform_indices = @transform_3, window_bounds = array<i64: 2, 128, 128>}, {pipeline_mode = #tpu.pipeline_mode<synchronous>, transform_indices = @transform_4, window_bounds = array<i64: 2, 1, 128>}, {pipeline_mode = #tpu.pipeline_mode<synchronous>, transform_indices = @transform_5, window_bounds = array<i64: 1, 128>}, {transform_indices = @transform_6, window_bounds = array<i64: 1, 1>}, {transform_indices = @transform_7, window_bounds = array<i64: 8, 1>}]} {
    %c0 = arith.constant 0 : index
    %c0_0 = arith.constant 0 : index
    %0 = vector.load %arg1[%c0, %c0_0] : memref<8x128xf32, #tpu.memory_space<vmem>>, vector<8x128xf32>
    %c0_1 = arith.constant 0 : index
    %c0_2 = arith.constant 0 : index
    %1 = vector.load %arg2[%c0_1, %c0_2] : memref<128x128xf32, #tpu.memory_space<vmem>>, vector<128x128xf32>
    %cst = arith.constant dense<0.000000e+00> : vector<8x128xf32>
    %2 = tpu.matmul %0, %1, %cst {dimension_numbers = #tpu.dot_dimension_numbers<[1], [0], [0], [1], [0, 0, 1, 1], [], []>} : vector<8x128xf32>, vector<128x128xf32>, vector<8x128xf32> -> vector<8x128xf32>
    %c0_3 = arith.constant 0 : index
    %c0_4 = arith.constant 0 : index
    %3 = vector.load %arg3[%c0_3, %c0_4] : memref<1x128xf32, #tpu.memory_space<vmem>>, vector<1x128xf32>
    %4 = vector.broadcast %3 : vector<1x128xf32> to vector<8x128xf32>
    %5 = arith.addf %2, %4 : vector<8x128xf32>
    %cst_5 = arith.constant 0.00999999977 : f32
    %6 = vector.broadcast %cst_5 : f32 to vector<8x128xf32>
    %7 = arith.mulf %6, %5 : vector<8x128xf32>
    %8 = arith.maximumf %5, %7 : vector<8x128xf32>
    %c0_6 = arith.constant 0 : index
    %c0_7 = arith.constant 0 : index
    %c0_8 = arith.constant 0 : index
    %9 = vector.load %arg4[%c0_6, %c0_7, %c0_8] : memref<2x128x128xf32, #tpu.memory_space<vmem>>, vector<1x128x128xf32>
    %10 = vector.shape_cast %9 : vector<1x128x128xf32> to vector<128x128xf32>
    %cst_9 = arith.constant dense<0.000000e+00> : vector<8x128xf32>
    %11 = tpu.matmul %8, %10, %cst_9 {dimension_numbers = #tpu.dot_dimension_numbers<[1], [0], [0], [1], [0, 0, 1, 1], [], []>} : vector<8x128xf32>, vector<128x128xf32>, vector<8x128xf32> -> vector<8x128xf32>
    %c0_10 = arith.constant 0 : index
    %c0_11 = arith.constant 0 : index
    %c0_12 = arith.constant 0 : index
    %12 = vector.load %arg5[%c0_10, %c0_11, %c0_12] : memref<2x1x128xf32, #tpu.memory_space<vmem>>, vector<1x1x128xf32>
    %13 = vector.shape_cast %12 : vector<1x1x128xf32> to vector<1x128xf32>
    %14 = vector.broadcast %13 : vector<1x128xf32> to vector<8x128xf32>
    %15 = arith.addf %11, %14 : vector<8x128xf32>
    %cst_13 = arith.constant 0.00999999977 : f32
    %16 = vector.broadcast %cst_13 : f32 to vector<8x128xf32>
    %17 = arith.mulf %16, %15 : vector<8x128xf32>
    %18 = arith.maximumf %15, %17 : vector<8x128xf32>
    %c1 = arith.constant 1 : index
    %c0_14 = arith.constant 0 : index
    %c0_15 = arith.constant 0 : index
    %19 = vector.load %arg4[%c1, %c0_14, %c0_15] : memref<2x128x128xf32, #tpu.memory_space<vmem>>, vector<1x128x128xf32>
    %20 = vector.shape_cast %19 : vector<1x128x128xf32> to vector<128x128xf32>
    %cst_16 = arith.constant dense<0.000000e+00> : vector<8x128xf32>
    %21 = tpu.matmul %18, %20, %cst_16 {dimension_numbers = #tpu.dot_dimension_numbers<[1], [0], [0], [1], [0, 0, 1, 1], [], []>} : vector<8x128xf32>, vector<128x128xf32>, vector<8x128xf32> -> vector<8x128xf32>
    %c1_17 = arith.constant 1 : index
    %c0_18 = arith.constant 0 : index
    %c0_19 = arith.constant 0 : index
    %22 = vector.load %arg5[%c1_17, %c0_18, %c0_19] : memref<2x1x128xf32, #tpu.memory_space<vmem>>, vector<1x1x128xf32>
    %23 = vector.shape_cast %22 : vector<1x1x128xf32> to vector<1x128xf32>
    %24 = vector.broadcast %23 : vector<1x128xf32> to vector<8x128xf32>
    %25 = arith.addf %21, %24 : vector<8x128xf32>
    %cst_20 = arith.constant 0.00999999977 : f32
    %26 = vector.broadcast %cst_20 : f32 to vector<8x128xf32>
    %27 = arith.mulf %26, %25 : vector<8x128xf32>
    %28 = arith.maximumf %25, %27 : vector<8x128xf32>
    %c0_21 = arith.constant 0 : index
    %c0_22 = arith.constant 0 : index
    %29 = vector.load %arg6[%c0_21, %c0_22] : memref<1x128xf32, #tpu.memory_space<vmem>>, vector<1x128xf32>
    %30 = vector.broadcast %29 : vector<1x128xf32> to vector<8x128xf32>
    %31 = arith.mulf %28, %30 : vector<8x128xf32>
    %cst_23 = arith.constant dense<0.000000e+00> : vector<8xf32>
    %32 = vector.multi_reduction <add>, %31, %cst_23 [1] : vector<8x128xf32> to vector<8xf32>
    %33 = vector.shape_cast %32 : vector<8xf32> to vector<8x1xf32>
    %c0_24 = arith.constant 0 : index
    %c0_25 = arith.constant 0 : index
    %34 = memref.load %arg7[%c0_24, %c0_25] : memref<1x1xf32, #tpu.memory_space<smem>>
    %35 = vector.broadcast %34 : f32 to vector<8x1xf32>
    %36 = arith.addf %33, %35 : vector<8x1xf32>
    %c0_26 = arith.constant 0 : index
    %c0_27 = arith.constant 0 : index
    %37 = vector.load %arg8[%c0_26, %c0_27] : memref<8x1xf32, #tpu.memory_space<vmem>>, vector<8x1xf32>
    tpu.vector_store %arg8[%c0_26, %c0_27], %36 {strides = array<i32>} : memref<8x1xf32, #tpu.memory_space<vmem>>, vector<8x1xf32>,
    return
  }
  func.func @transform_0(%arg0: i32) -> (i32, i32) {
    %c0_i32 = arith.constant 0 : i32
    %c0_i32_0 = arith.constant 0 : i32
    return %arg0, %c0_i32 : i32, i32
  }
  func.func @transform_1(%arg0: i32) -> (i32, i32) {
    %c0_i32 = arith.constant 0 : i32
    %c0_i32_0 = arith.constant 0 : i32
    %c0_i32_1 = arith.constant 0 : i32
    return %c0_i32, %c0_i32_0 : i32, i32
  }
  func.func @transform_2(%arg0: i32) -> (i32, i32) {
    %c0_i32 = arith.constant 0 : i32
    %c0_i32_0 = arith.constant 0 : i32
    %c0_i32_1 = arith.constant 0 : i32
    return %c0_i32, %c0_i32_0 : i32, i32
  }
  func.func @transform_3(%arg0: i32) -> (i32, i32, i32) {
    %c0_i32 = arith.constant 0 : i32
    %c0_i32_0 = arith.constant 0 : i32
    %c0_i32_1 = arith.constant 0 : i32
    %c0_i32_2 = arith.constant 0 : i32
    return %c0_i32, %c0_i32_0, %c0_i32_1 : i32, i32, i32
  }
  func.func @transform_4(%arg0: i32) -> (i32, i32, i32) {
    %c0_i32 = arith.constant 0 : i32
    %c0_i32_0 = arith.constant 0 : i32
    %c0_i32_1 = arith.constant 0 : i32
    %c0_i32_2 = arith.constant 0 : i32
    return %c0_i32, %c0_i32_0, %c0_i32_1 : i32, i32, i32
  }
  func.func @transform_5(%arg0: i32) -> (i32, i32) {
    %c0_i32 = arith.constant 0 : i32
    %c0_i32_0 = arith.constant 0 : i32
    %c0_i32_1 = arith.constant 0 : i32
    return %c0_i32, %c0_i32_0 : i32, i32
  }
  func.func @transform_6(%arg0: i32) -> (i32, i32) {
    %c0_i32 = arith.constant 0 : i32
    %c0_i32_0 = arith.constant 0 : i32
    %c0_i32_1 = arith.constant 0 : i32
    return %c0_i32, %c0_i32_0 : i32, i32
  }
  func.func @transform_7(%arg0: i32) -> (i32, i32) {
    %c0_i32 = arith.constant 0 : i32
    %c0_i32_0 = arith.constant 0 : i32
    return %arg0, %c0_i32 : i32, i32
  }
}

</mosaic_0001>

<bundles_post_ra>
// kernel: tpu_custom_call.1
= control target key start
LH: loop header
LB: loop body
LE: loop exit
PB: predicated region body
PF: predicated region fallthrough
CT: control target
= control target key end

     0   :  { %13 = vsyncpa [#allocation4], 0  ;;  %s377_s0 = inlined_call_operand.hbm [shape: f32[8,128], index: 0, kind: input, shape index: {}]   ;;  %s378_s1 = inlined_call_operand.hbm [shape: f32[128,128], index: 1, kind: input, shape index: {}]   ;;  %s379_s2 = inlined_call_operand.vmem [shape: f32[1,128], index: 2, kind: input, shape index: {}]   ;;  %s380_s3 = inlined_call_operand.hbm [shape: f32[2,128,128], index: 3, kind: input, shape index: {}]   ;;  %s381_s4 = inlined_call_operand.vmem [shape: f32[2,1,128], index: 4, kind: input, shape index: {}]   ;;  %s382_s5 = inlined_call_operand.vmem [shape: f32[1,128], index: 5, kind: input, shape index: {}]   ;;  %s383_s6 = inlined_call_operand.<no memory space> [shape: f32[1,1], index: 6, kind: input, shape index: {}]   ;;  %s384_s7 = inlined_call_operand.vmem [shape: f32[8,1], index: 7, kind: output, shape index: {}]  }
   0x1   :  { %14 = vsyncpa [#allocation6], 0  ;;  %s30_s26 = sshll.u32 %s378_s1, 4  ;;  %s305_s27 = smov [#allocation5]   ;;  %s31_s26 = int_to_ptr.hbm [resolvable:$true] %s30_s26 }
   0x2   :  { %s32_s28 = sshll.u32 %s305_s27, 4  ;;  %s20_s8 = sshll.u32 %s377_s0, 4  ;;  %s33_s28 = int_to_ptr.vmem [resolvable:$true] %s32_s28  ;;  %s21_s8 = int_to_ptr.hbm [resolvable:$true] %s20_s8 }
   0x3   :  { %s306_s9 = smov 128   ;;  %s307_s10 = smov 8  }
   0x4   :  { %38 = dma.hbm_to_vmem [thread:$0]  %s31_s26, 2048, %s33_s28, [#allocation6], %s306_s9, %s306_s9, %s307_s10  }
   0x5   :  { %s308_s11 = smov [#allocation3]   ;;  %s45_s15 = sshll.u32 %s380_s3, 4  ;;  %s46_s15 = int_to_ptr.hbm [resolvable:$true] %s45_s15 }
   0x6   :  { %s22_s12 = sshll.u32 %s308_s11, 4  ;;  %s309_s1 = smov [#allocation7]   ;;  %s23_s12 = int_to_ptr.vmem [resolvable:$true] %s22_s12 }
   0x7   :  { %25 = dma.hbm_to_vmem [thread:$0]  %s21_s8, 128, %s23_s12, [#allocation4]  }
   0x8   :  { %s47_s16 = sshll.u32 %s309_s1, 4  ;;  %s48_s16 = int_to_ptr.vmem [resolvable:$true] %s47_s16 }
   0x9   :  { %53 = dma.hbm_to_vmem [thread:$0]  %s46_s15, 4096, %s48_s16, [#allocation6], %s306_s9, %s306_s9, %s307_s10  }
   0xa   :  { %301 = dma.done.wait [#allocation4], 128  }
   0xb   :  { %302 = vsyncadd [#allocation4], 4294967168 }
   0xc   :  { %303 = dma.done.wait [#allocation6], 6144  }
   0xd   :  { %304 = vsyncadd [#allocation6], 4294961152  ;;  %v88_v0 = vld [vmem:[#allocation5 + $0x78] sm:$0xff]  ;;  %v87_v1 = vld [vmem:[#allocation5 + $0x70] sm:$0xff]  ;;  %vm211_vm0 = vcmask 7168  }
   0xe   :  { %93 = vmatpush.msra.mxu0 %v88_v0  ;;  %v86_v2 = vld [vmem:[#allocation5 + $0x68] sm:$0xff]  ;;  %v85_v3 = vld [vmem:[#allocation5 + $0x60] sm:$0xff]  ;;  %v130_v4 = vld [vmem:[#allocation7 + $0x78] sm:$0xff] }
   0xf   :  { %v84_v5 = vld [vmem:[#allocation5 + $0x58] sm:$0xff]  ;;  %135 = vmatpush.msra.mxu1 %v130_v4  ;;  %v129_v6 = vld [vmem:[#allocation7 + $0x70] sm:$0xff]  ;;  %v128_v7 = vld [vmem:[#allocation7 + $0x68] sm:$0xff] }
  0x10   :  { %94 = vmatpush.msra.mxu0 %v87_v1  ;;  %v83_v8 = vld [vmem:[#allocation5 + $0x50] sm:$0xff]  ;;  %v127_v9 = vld [vmem:[#allocation7 + $0x60] sm:$0xff]  ;;  %v82_v10 = vld [vmem:[#allocation5 + $0x48] sm:$0xff] }
  0x11   :  { %136 = vmatpush.msra.mxu1 %v129_v6  ;;  %v126_v11 = vld [vmem:[#allocation7 + $0x58] sm:$0xff]  ;;  %v81_v12 = vld [vmem:[#allocation5 + $0x40] sm:$0xff]  ;;  %v125_v13 = vld [vmem:[#allocation7 + $0x50] sm:$0xff] }
  0x12   :  { %95 = vmatpush.msra.mxu0 %v86_v2  ;;  %v80_v14 = vld [vmem:[#allocation5 + $0x38] sm:$0xff]  ;;  %v124_v15 = vld [vmem:[#allocation7 + $0x48] sm:$0xff]  ;;  %v79_v16 = vld [vmem:[#allocation5 + $0x30] sm:$0xff]  ;;  %v209_v2 = vstv %s383_s6 }
  0x13   :  { %137 = vmatpush.msra.mxu1 %v128_v7  ;;  %v123_v17 = vld [vmem:[#allocation7 + $0x40] sm:$0xff]  ;;  %v78_v18 = vld [vmem:[#allocation5 + $0x28] sm:$0xff]  ;;  %v122_v19 = vld [vmem:[#allocation7 + $0x38] sm:$0xff] }
  0x14   :  { %96 = vmatpush.msra.mxu0 %v85_v3  ;;  %v77_v20 = vld [vmem:[#allocation5 + $0x20] sm:$0xff]  ;;  %v121_v21 = vld [vmem:[#allocation7 + $0x30] sm:$0xff]  ;;  %v76_v22 = vld [vmem:[#allocation5 + $0x18] sm:$0xff] }
  0x15   :  { %138 = vmatpush.msra.mxu1 %v127_v9  ;;  %v120_v23 = vld [vmem:[#allocation7 + $0x28] sm:$0xff]  ;;  %v75_v24 = vld [vmem:[#allocation5 + $0x10] sm:$0xff]  ;;  %v119_v25 = vld [vmem:[#allocation7 + $0x20] sm:$0xff] }
  0x16   :  { %97 = vmatpush.msra.mxu0 %v84_v5  ;;  %v74_v26 = vld [vmem:[#allocation5 + $0x8] sm:$0xff]  ;;  %v73_v27 = vld [vmem:[#allocation5] sm:$0xff]  ;;  %v72_v28 = vld [vmem:[#allocation3] sm:$0xff] }
  0x17   :  { %139 = vmatpush.msra.mxu1 %v126_v11  ;;  %v118_v29 = vld [vmem:[#allocation7 + $0x18] sm:$0xff]  ;;  %v117_v30 = vld [vmem:[#allocation7 + $0x10] sm:$0xff]  ;;  %v116_v31 = vld [vmem:[#allocation7 + $0x8] sm:$0xff] }
  0x18   :  { %98 = vmatpush.msra.mxu0 %v83_v8  ;;  %v115_v32 = vld [vmem:[#allocation7] sm:$0xff]  ;;  %v173_v33 = vld [vmem:[#allocation7 + $0xf8] sm:$0xff]  ;;  %v172_v34 = vld [vmem:[#allocation7 + $0xf0] sm:$0xff] }
  0x19   :  { %140 = vmatpush.msra.mxu1 %v125_v13  ;;  %179 = vmatpush.msra.mxu2 %v173_v33  ;;  %v171_v35 = vld [vmem:[#allocation7 + $0xe8] sm:$0xff]  ;;  %v170_v36 = vld [vmem:[#allocation7 + $0xe0] sm:$0xff]  ;;  %v169_v37 = vld [vmem:[#allocation7 + $0xd8] sm:$0xff] }
  0x1a   :  { %99 = vmatpush.msra.mxu0 %v82_v10  ;;  %v168_v38 = vld [vmem:[#allocation7 + $0xd0] sm:$0xff]  ;;  %v167_v39 = vld [vmem:[#allocation7 + $0xc8] sm:$0xff]  ;;  %v166_v40 = vld [vmem:[#allocation7 + $0xc0] sm:$0xff] }
  0x1b   :  { %141 = vmatpush.msra.mxu1 %v124_v15  ;;  %180 = vmatpush.msra.mxu2 %v172_v34  ;;  %v165_v41 = vld [vmem:[#allocation7 + $0xb8] sm:$0xff]  ;;  %v164_v42 = vld [vmem:[#allocation7 + $0xb0] sm:$0xff]  ;;  %v163_v43 = vld [vmem:[#allocation7 + $0xa8] sm:$0xff] }
  0x1c   :  { %100 = vmatpush.msra.mxu0 %v81_v12  ;;  %v162_v44 = vld [vmem:[#allocation7 + $0xa0] sm:$0xff]  ;;  %v225_v45 = vld [vmem:[%s379_s2] ss:$0 sm:$0xff]  ;;  %v160_v51 = vld [vmem:[#allocation7 + $0x90] sm:$0xff] }
  0x1d   :  { %142 = vmatpush.msra.mxu1 %v123_v17  ;;  %181 = vmatpush.msra.mxu2 %v171_v35  ;;  %v161_v50 = vld [vmem:[#allocation7 + $0x98] sm:$0xff]  ;;  %v159_v52 = vld [vmem:[#allocation7 + $0x88] sm:$0xff]  ;;  %v158_v53 = vld [vmem:[#allocation7 + $0x80] sm:$0xff] }
  0x1e   :  { %101 = vmatpush.msra.mxu0 %v80_v14  ;;  %v226_v54 = vld [vmem:[%s381_s4] ss:$0 sm:$0xff]  ;;  %v227_v59 = vld [vmem:[%s381_s4 + $0x1] ss:$0 sm:$0xff] }
  0x1f   :  { %143 = vmatpush.msra.mxu1 %v122_v19  ;;  %182 = vmatpush.msra.mxu2 %v170_v36  ;;  %v228_v63 = vld [vmem:[%s382_s5] ss:$0 sm:$0xff] }
  0x20   :  { %102 = vmatpush.msra.mxu0 %v79_v16 }
  0x21   :  { %144 = vmatpush.msra.mxu1 %v121_v21  ;;  %183 = vmatpush.msra.mxu2 %v169_v37 }
  0x22   :  { %103 = vmatpush.msra.mxu0 %v78_v18 }
  0x23   :  { %145 = vmatpush.msra.mxu1 %v120_v23  ;;  %184 = vmatpush.msra.mxu2 %v168_v38 }
  0x24   :  { %104 = vmatpush.msra.mxu0 %v77_v20 }
  0x25   :  { %146 = vmatpush.msra.mxu1 %v119_v25  ;;  %185 = vmatpush.msra.mxu2 %v167_v39 }
  0x26   :  { %105 = vmatpush.msra.mxu0 %v76_v22 }
  0x27   :  { %147 = vmatpush.msra.mxu1 %v118_v29  ;;  %186 = vmatpush.msra.mxu2 %v166_v40 }
  0x28   :  { %106 = vmatpush.msra.mxu0 %v75_v24 }
  0x29   :  { %148 = vmatpush.msra.mxu1 %v117_v30  ;;  %187 = vmatpush.msra.mxu2 %v165_v41 }
  0x2a   :  { %107 = vmatpush.msra.mxu0 %v74_v26 }
  0x2b   :  { %149 = vmatpush.msra.mxu1 %v116_v31  ;;  %188 = vmatpush.msra.mxu2 %v164_v42 }
  0x2c   :  { %108 = vmatpush.msra.mxu0 %v73_v27 }
  0x2d   :  { %109 = vmatmul.f32.vlgmr.msra.gmra.mxu0 %v72_v28  ;;  %150 = vmatpush.msra.mxu1 %v115_v32 }
  0x2e   :  { %189 = vmatpush.msra.mxu2 %v163_v43 }
  0x30   :  { %190 = vmatpush.msra.mxu2 %v162_v44 }
  0x32   :  { %191 = vmatpush.msra.mxu2 %v161_v50 }
  0x34   :  { %192 = vmatpush.msra.mxu2 %v160_v51 }
  0x36   :  { %193 = vmatpush.msra.mxu2 %v159_v52 }
  0x38   :  { %194 = vmatpush.msra.mxu2 %v158_v53 }
  0xaa   :  { %v110_v46 = vpop.f32.mrf.mxu0 }
  0xab   :  { %v111_v47 = vadd.f32 %v225_v45, %v110_v46 }
  0xad   :  { %v113_v48 = vmul.f32 0.01, %v111_v47 }
  0xaf   :  { %v114_v49 = vmax.f32 %v111_v47, %v113_v48 }
  0xb1   :  { %151 = vmatmul.f32.vlgmr.msra.gmra.mxu1 %v114_v49 }
 0x12e   :  { %v152_v55 = vpop.f32.mrf.mxu1 }
 0x12f   :  { %v153_v56 = vadd.f32 %v226_v54, %v152_v55 }
 0x131   :  { %v155_v57 = vmul.f32 0.01, %v153_v56 }
 0x133   :  { %v156_v58 = vmax.f32 %v153_v56, %v155_v57 }
 0x135   :  { %195 = vmatmul.f32.vlgmr.msra.gmra.mxu2 %v156_v58 }
 0x1b8   :  { %v196_v60 = vpop.f32.mrf.mxu2 }
 0x1b9   :  { %v197_v61 = vadd.f32 %v227_v59, %v196_v60 }
 0x1bb   :  { %v199_v62 = vmul.f32 0.01, %v197_v61 }
 0x1bd   :  { %v200_v0 = vmax.f32 %v197_v61, %v199_v62 }
 0x1bf   :  { %v205_v1 = vmul.f32 %v228_v63, %v200_v0 }
 0x1c1   :  { %206 = vadd.xlane.f32.xlu0 %v205_v1 }
 0x234   :  { %v207_v3 = vpop.xlane.xlu0 %206 }
 0x235   :  { %v210_v4 = vadd.f32 %v209_v2, %v207_v3 }
 0x237   :  { %212 = vst.msk [vmem:[%s384_s7] sm:$0xff] %vm211_vm0, %v210_v4 }
 0x238   :  { %217 = vsyncpa [#allocation4], 1 }
 0x239   :  { %218 = vsyncpa [#allocation6], 1 }

</bundles_post_ra>
